<compile_context>
chip_gen: v7x
topology: tpu7x:2x2x1
jax: 0.10.0
libtpu: 0.0.40
codegen_flags: <defaults>
</compile_context>

<pallas_src>
import functools

import jax
import jax.numpy as jnp
from jax.experimental import pallas as pl
from jax.experimental.pallas import tpu as pltpu


def fm_kernel(w0_ref, x_ref, r_ref, s_ref, out_ref, *, k):
    # w0_ref : SMEM (1, 1)   global bias
    # x_ref  : VMEM (TB, Fp) batch tile of X
    # r_ref  : VMEM (Fp,K+1) fused [v | w1], resident across grid steps
    # s_ref  : VMEM (Fp, 1)  per-feature sum_k v_fk^2, resident
    # out_ref: VMEM (TB, 1)
    x = x_ref[...]

    # One MXU pass of X for both inter_1 (= X @ v) and the linear term (= X @ w1).
    z = jnp.dot(x, r_ref[...], preferred_element_type=jnp.float32)      # (TB, K+1)
    # Second-order "diagonal" correction as a matvec: (X^2) @ sum_k v^2.
    q = jnp.dot(x * x, s_ref[...], preferred_element_type=jnp.float32)  # (TB, 1)

    linear = z[:, k:k + 1]                                               # (TB, 1)
    # sum_j z_j^2 includes linear^2 (last column); subtract it instead of a
    # masked lane slice before the cross-lane reduce.
    zz_sum = jnp.sum(z * z, axis=1, keepdims=True)                       # (TB, 1)
    interaction = 0.5 * (zz_sum - linear * linear - q)

    out_ref[...] = w0_ref[0, 0] + linear + interaction


def _round_up(x, m):
    return (x + m - 1) // m * m


def _vmem_limit_bytes():
    """Per-generation scoped VMEM request.

    v5e/v6e have 128 MiB physical VMEM -> ask for 64 MiB; v7x has 64 MiB per
    TensorCore -> ask for 48 MiB.  Derived from the hardware query so a tile
    sized for v6e does not OOM on v7x.
    """
    try:
        cap = pltpu.get_tpu_info().vmem_capacity_bytes
    except Exception:  # non-TPU tracing / older runtime: assume the smallest.
        cap = 64 * 1024 * 1024
    return min(64 * 1024 * 1024, (cap * 3) // 4)


def _pick_batch_tile(b, fp, x_itemsize, vmem_limit):
    """Largest TB (multiple of 8) whose working set stays inside the budget.

    Per-row VMEM footprint at tile size TB (bytes), counted conservatively:
      * 2 double-buffered X blocks + the materialized x*x temporary:
            3 * Fp * x_itemsize
      * z and z*z intermediates, lane-padded to 128 f32 lanes:  2 * 128 * 4
      * double-buffered (TB, 1) output, lane-padded to 128:     2 * 128 * 4
    We spend ~75% of the scoped limit on this, leaving headroom for R, s and
    compiler scratch.
    """
    bytes_per_row = 3 * fp * x_itemsize + 4 * 128 * 4
    tb = (vmem_limit * 3 // 4) // bytes_per_row
    tb = min(tb, 16384, _round_up(b, 8))
    tb = max(8, (tb // 8) * 8)
    return int(tb)


def fm_forward(x, w0, w1, v, *, x_stream_dtype=None):
    """FM forward.

    x: (B, F); w0: (1, 1); w1: (F, 1); v: (F, K)  ->  (B, 1) float32.
    x_stream_dtype: optionally jnp.bfloat16 to halve X HBM traffic (the
    kernel is HBM-bound on X); default None keeps exact float32 semantics.
    """
    x_dtype = jnp.float32 if x_stream_dtype is None else x_stream_dtype
    x = x.astype(x_dtype)
    B, F = x.shape
    K = v.shape[1]

    # Zero-pad the feature axis to a lane multiple (exact no-op for FM terms).
    Fp = _round_up(F, 128)
    if Fp != F:
        x = jnp.pad(x, ((0, 0), (0, Fp - F)))
        w1 = jnp.pad(w1, ((0, Fp - F), (0, 0)))
        v = jnp.pad(v, ((0, Fp - F), (0, 0)))

    vmem_limit = _vmem_limit_bytes()
    TB = _pick_batch_tile(B, Fp, jnp.dtype(x_dtype).itemsize, vmem_limit)
    Bp = _round_up(B, TB)
    if Bp != B:
        x = jnp.pad(x, ((0, Bp - B), (0, 0)))

    # Hoisted, fused parameters (computed once in the wrapper, tiny).
    r = jnp.concatenate([v, w1], axis=1).astype(jnp.float32)        # (Fp, K+1)
    s = jnp.sum(v.astype(jnp.float32) ** 2, axis=1, keepdims=True)  # (Fp, 1)
    w0 = jnp.reshape(w0, (1, 1)).astype(jnp.float32)

    grid = (Bp // TB,)
    flops = 2 * Bp * Fp * (K + 2) + 6 * Bp * (K + 2)
    bytes_accessed = (Bp * Fp * jnp.dtype(x_dtype).itemsize
                      + Fp * (K + 2) * 4 + Bp * 4)

    out = pl.pallas_call(
        functools.partial(fm_kernel, k=K),
        out_shape=jax.ShapeDtypeStruct((Bp, 1), jnp.float32),
        grid=grid,
        in_specs=[
            pl.BlockSpec(memory_space=pltpu.MemorySpace.SMEM),   # w0 scalar
            pl.BlockSpec((TB, Fp), lambda i: (i, 0)),            # X, batch-tiled
            pl.BlockSpec((Fp, K + 1), lambda i: (0, 0)),         # R, resident
            pl.BlockSpec((Fp, 1), lambda i: (0, 0)),             # s, resident
        ],
        out_specs=pl.BlockSpec((TB, 1), lambda i: (i, 0)),
        compiler_params=pltpu.CompilerParams(
            dimension_semantics=("parallel",),
            vmem_limit_bytes=vmem_limit,
        ),
        cost_estimate=pl.CostEstimate(
            flops=flops, transcendentals=0, bytes_accessed=bytes_accessed),
    )(w0, x, r, s)

    return out[:B]


def init_params(key, feature_size, k):
    """Deterministic init matching the PyTorch module's __init__ shapes."""
    k0, k1, k2 = jax.random.split(key, 3)
    w0 = jax.random.normal(k0, (1, 1), dtype=jnp.float32)
    std_w1 = (2.0 / (feature_size + 1)) ** 0.5
    w1 = std_w1 * jax.random.normal(k1, (feature_size, 1), dtype=jnp.float32)
    std_v = (2.0 / (feature_size + k)) ** 0.5
    v = std_v * jax.random.normal(k2, (feature_size, k), dtype=jnp.float32)
    return w0, w1, v


def fm_reference(x, w0, w1, v):
    """Pure-JAX reference mirroring the PyTorch forward exactly."""
    inter_1 = x @ v
    inter_2 = (x ** 2) @ (v ** 2)
    interaction = (0.5 * jnp.sum(inter_1 ** 2 - inter_2, axis=1)).reshape(x.shape[0], 1)
    return w0[0, 0] + x @ w1 + interaction


if __name__ == "__main__":
    batch = 8
    feature_size = 32
    k = 8

    key = jax.random.PRNGKey(0)
    key_x, key_p = jax.random.split(key)
    x = jax.random.normal(key_x, (batch, feature_size), dtype=jnp.float32)
    w0, w1, v = init_params(key_p, feature_size, k)

    out = fm_forward(x, w0, w1, v)
    out = jax.block_until_ready(out)

    ref = fm_reference(x, w0, w1, v)
    assert out.shape == (batch, 1)
    assert jnp.allclose(out, ref, rtol=1e-5, atol=1e-5), (out, ref)

    print("KERNEL_OK")
</pallas_src>

<mosaic_0001>
module attributes {stable_mosaic.version = 11 : i64} {
  func.func @fm_kernel(%arg0: i32, %arg1: memref<1x1xf32, #tpu.memory_space<smem>>, %arg2: memref<8x128xf32, #tpu.memory_space<vmem>>, %arg3: memref<128x9xf32, #tpu.memory_space<vmem>>, %arg4: memref<128x1xf32, #tpu.memory_space<vmem>>, %arg5: memref<8x1xf32, #tpu.memory_space<vmem>>) attributes {dimension_semantics = [#tpu.dimension_semantics<parallel>], iteration_bounds = array<i64: 1>, scalar_prefetch = 0 : i64, scratch_operands = 0 : i64, tpu.core_type = #tpu.core_type<tc>, window_params = [{transform_indices = @transform_0, window_bounds = array<i64: 1, 1>}, {transform_indices = @transform_1, window_bounds = array<i64: 8, 128>}, {pipeline_mode = #tpu.pipeline_mode<synchronous>, transform_indices = @transform_2, window_bounds = array<i64: 128, 9>}, {pipeline_mode = #tpu.pipeline_mode<synchronous>, transform_indices = @transform_3, window_bounds = array<i64: 128, 1>}, {transform_indices = @transform_4, window_bounds = array<i64: 8, 1>}]} {
    %c0 = arith.constant 0 : index
    %c0_0 = arith.constant 0 : index
    %0 = vector.load %arg2[%c0, %c0_0] : memref<8x128xf32, #tpu.memory_space<vmem>>, vector<8x128xf32>
    %c0_1 = arith.constant 0 : index
    %c0_2 = arith.constant 0 : index
    %1 = vector.load %arg3[%c0_1, %c0_2] : memref<128x9xf32, #tpu.memory_space<vmem>>, vector<128x9xf32>
    %cst = arith.constant dense<0.000000e+00> : vector<8x9xf32>
    %2 = tpu.matmul %0, %1, %cst {dimension_numbers = #tpu.dot_dimension_numbers<[1], [0], [0], [1], [0, 0, 1, 1], [], []>} : vector<8x128xf32>, vector<128x9xf32>, vector<8x9xf32> -> vector<8x9xf32>
    %3 = arith.mulf %0, %0 : vector<8x128xf32>
    %c0_3 = arith.constant 0 : index
    %c0_4 = arith.constant 0 : index
    %4 = vector.load %arg4[%c0_3, %c0_4] : memref<128x1xf32, #tpu.memory_space<vmem>>, vector<128x1xf32>
    %cst_5 = arith.constant dense<0.000000e+00> : vector<8x1xf32>
    %5 = tpu.matmul %3, %4, %cst_5 {dimension_numbers = #tpu.dot_dimension_numbers<[1], [0], [0], [1], [0, 0, 1, 1], [], []>} : vector<8x128xf32>, vector<128x1xf32>, vector<8x1xf32> -> vector<8x1xf32>
    %6 = vector.extract_strided_slice %2 {offsets = [0, 8], sizes = [8, 1], strides = [1, 1]} : vector<8x9xf32> to vector<8x1xf32>
    %7 = arith.mulf %2, %2 : vector<8x9xf32>
    %cst_6 = arith.constant dense<0.000000e+00> : vector<8xf32>
    %8 = vector.multi_reduction <add>, %7, %cst_6 [1] : vector<8x9xf32> to vector<8xf32>
    %9 = vector.shape_cast %8 : vector<8xf32> to vector<8x1xf32>
    %10 = arith.mulf %6, %6 : vector<8x1xf32>
    %11 = arith.subf %9, %10 : vector<8x1xf32>
    %12 = arith.subf %11, %5 : vector<8x1xf32>
    %cst_7 = arith.constant 5.000000e-01 : f32
    %13 = vector.broadcast %cst_7 : f32 to vector<8x1xf32>
    %14 = arith.mulf %13, %12 : vector<8x1xf32>
    %c0_8 = arith.constant 0 : index
    %c0_9 = arith.constant 0 : index
    %15 = memref.load %arg1[%c0_8, %c0_9] : memref<1x1xf32, #tpu.memory_space<smem>>
    %16 = vector.broadcast %15 : f32 to vector<8x1xf32>
    %17 = arith.addf %16, %6 : vector<8x1xf32>
    %18 = arith.addf %17, %14 : vector<8x1xf32>
    %c0_10 = arith.constant 0 : index
    %c0_11 = arith.constant 0 : index
    %19 = vector.load %arg5[%c0_10, %c0_11] : memref<8x1xf32, #tpu.memory_space<vmem>>, vector<8x1xf32>
    tpu.vector_store %arg5[%c0_10, %c0_11], %18 {strides = array<i32>} : memref<8x1xf32, #tpu.memory_space<vmem>>, vector<8x1xf32>,
    return
  }
  func.func @transform_0(%arg0: i32) -> (i32, i32) {
    %c0_i32 = arith.constant 0 : i32
    %c0_i32_0 = arith.constant 0 : i32
    %c0_i32_1 = arith.constant 0 : i32
    return %c0_i32, %c0_i32_0 : i32, i32
  }
  func.func @transform_1(%arg0: i32) -> (i32, i32) {
    %c0_i32 = arith.constant 0 : i32
    %c0_i32_0 = arith.constant 0 : i32
    return %arg0, %c0_i32 : i32, i32
  }
  func.func @transform_2(%arg0: i32) -> (i32, i32) {
    %c0_i32 = arith.constant 0 : i32
    %c0_i32_0 = arith.constant 0 : i32
    %c0_i32_1 = arith.constant 0 : i32
    return %c0_i32, %c0_i32_0 : i32, i32
  }
  func.func @transform_3(%arg0: i32) -> (i32, i32) {
    %c0_i32 = arith.constant 0 : i32
    %c0_i32_0 = arith.constant 0 : i32
    %c0_i32_1 = arith.constant 0 : i32
    return %c0_i32, %c0_i32_0 : i32, i32
  }
  func.func @transform_4(%arg0: i32) -> (i32, i32) {
    %c0_i32 = arith.constant 0 : i32
    %c0_i32_0 = arith.constant 0 : i32
    return %arg0, %c0_i32 : i32, i32
  }
}

</mosaic_0001>

<bundles_post_ra>
// kernel: tpu_custom_call.1
= control target key start
LH: loop header
LB: loop body
LE: loop exit
PB: predicated region body
PF: predicated region fallthrough
CT: control target
= control target key end

     0   :  { %v375_v0 = vmov 0.0|0.0   ;;  %vm376_vm0 = vmmov 0   ;;  %v377_v4 = vmov 0.0   ;;  %vm193_vm1 = vcmask 72704   ;;  %s379_s29 = smov 120   ;;  %s526_s2 = inlined_call_operand.vmem [shape: f32[128,9], index: 2, kind: input, shape index: {}]   ;;  %s527_s3 = inlined_call_operand.vmem [shape: f32[128,1], index: 3, kind: input, shape index: {}]   ;;  %s528_s1 = inlined_call_operand.vmem [shape: f32[8,128], index: 1, kind: input, shape index: {}]   ;;  %s529_s0 = inlined_call_operand.<no memory space> [shape: f32[1,1], index: 0, kind: input, shape index: {}]   ;;  %s530_s4 = inlined_call_operand.vmem [shape: f32[8,1], index: 4, kind: output, shape index: {}]  }
   0x1   :  { %322 = vmatprep.subr.bf16.mxu0 %v375_v0  ;;  %v19_v1 = vld [vmem:[%s526_s2] sm:$0xff]  ;;  %v20_v2 = vld [vmem:[%s526_s2 + $0x8] sm:$0xff]  ;;  %v21_v3 = vld [vmem:[%s526_s2 + $0x10] sm:$0xff]  ;;  %284 = vmatprep.mubr.msk.f32.mxu0 %vm376_vm0, %v377_v4  ;;  %v205_v60 = vstv %s529_s0  ;;  %vm212_vm2 = vcmask 7168  }
   0x2   :  { %v323_v5 = vpack.c.bf16 %v20_v2, %v19_v1  ;;  %v22_v6 = vld [vmem:[%s526_s2 + $0x18] sm:$0xff]  ;;  %346 = vmatprep.subr.bf16.mxu1 %v375_v0  ;;  %319 = vmatprep.mubr.msk.f32.mxu1 %vm376_vm0, %v377_v4  ;;  %v23_v8 = vld [vmem:[%s526_s2 + $0x20] sm:$0xff]  ;;  %v24_v9 = vld [vmem:[%s526_s2 + $0x28] sm:$0xff] }
   0x3   :  { %v326_v7 = vpack.c.bf16 %v22_v6, %v21_v3  ;;  %v106_v10 = vld [vmem:[%s527_s3] sm:$0xff]  ;;  %v107_v11 = vld [vmem:[%s527_s3 + $0x8] sm:$0xff]  ;;  %v108_v12 = vld [vmem:[%s527_s3 + $0x10] sm:$0xff]  ;;  %v329_v14 = vpack.c.bf16 %v24_v9, %v23_v8 }
   0x4   :  { %324 = vmatpush3.bf16.msra.mxu0 %v323_v5  ;;  %v109_v13 = vld [vmem:[%s527_s3 + $0x18] sm:$0xff]  ;;  %v347_v15 = vpack.c.bf16 %v107_v11, %v106_v10  ;;  %v25_v16 = vld [vmem:[%s526_s2 + $0x30] sm:$0xff]  ;;  %v110_v19 = vld [vmem:[%s527_s3 + $0x20] sm:$0xff] }
   0x5   :  { %325 = vmatprep.subr.bf16.mxu0 %v375_v0  ;;  %v26_v17 = vld [vmem:[%s526_s2 + $0x38] sm:$0xff]  ;;  %v350_v18 = vpack.c.bf16 %v109_v13, %v108_v12  ;;  %v111_v20 = vld [vmem:[%s527_s3 + $0x28] sm:$0xff]  ;;  %v27_v22 = vld [vmem:[%s526_s2 + $0x40] sm:$0xff] }
   0x6   :  { %348 = vmatpush3.bf16.msra.mxu1 %v347_v15  ;;  %v332_v21 = vpack.c.bf16 %v26_v17, %v25_v16  ;;  %v28_v23 = vld [vmem:[%s526_s2 + $0x48] sm:$0xff]  ;;  %v353_v24 = vpack.c.bf16 %v111_v20, %v110_v19  ;;  %v112_v25 = vld [vmem:[%s527_s3 + $0x30] sm:$0xff]  ;;  %v113_v26 = vld [vmem:[%s527_s3 + $0x38] sm:$0xff] }
   0x7   :  { %349 = vmatprep.subr.bf16.mxu1 %v375_v0  ;;  %v335_v27 = vpack.c.bf16 %v28_v23, %v27_v22  ;;  %v29_v28 = vld [vmem:[%s526_s2 + $0x50] sm:$0xff]  ;;  %v30_v29 = vld [vmem:[%s526_s2 + $0x58] sm:$0xff]  ;;  %v356_v30 = vpack.c.bf16 %v113_v26, %v112_v25  ;;  %v114_v31 = vld [vmem:[%s527_s3 + $0x40] sm:$0xff] }
   0x8   :  { %327 = vmatpush3.bf16.msra.mxu0 %v326_v7  ;;  %v115_v32 = vld [vmem:[%s527_s3 + $0x48] sm:$0xff]  ;;  %v338_v33 = vpack.c.bf16 %v30_v29, %v29_v28  ;;  %v31_v34 = vld [vmem:[%s526_s2 + $0x60] sm:$0xff]  ;;  %v116_v37 = vld [vmem:[%s527_s3 + $0x50] sm:$0xff] }
   0x9   :  { %328 = vmatprep.subr.bf16.mxu0 %v375_v0  ;;  %v32_v35 = vld [vmem:[%s526_s2 + $0x68] sm:$0xff]  ;;  %v359_v36 = vpack.c.bf16 %v115_v32, %v114_v31  ;;  %v117_v38 = vld [vmem:[%s527_s3 + $0x58] sm:$0xff]  ;;  %v33_v40 = vld [vmem:[%s526_s2 + $0x70] sm:$0xff] }
   0xa   :  { %351 = vmatpush3.bf16.msra.mxu1 %v350_v18  ;;  %v341_v39 = vpack.c.bf16 %v32_v35, %v31_v34  ;;  %v34_v41 = vld [vmem:[%s526_s2 + $0x78] sm:$0xff]  ;;  %v362_v42 = vpack.c.bf16 %v117_v38, %v116_v37  ;;  %v118_v43 = vld [vmem:[%s527_s3 + $0x60] sm:$0xff]  ;;  %v119_v44 = vld [vmem:[%s527_s3 + $0x68] sm:$0xff] }
   0xb   :  { %352 = vmatprep.subr.bf16.mxu1 %v375_v0  ;;  %v344_v45 = vpack.c.bf16 %v34_v41, %v33_v40  ;;  %v365_v46 = vpack.c.bf16 %v119_v44, %v118_v43  ;;  %v120_v47 = vld [vmem:[%s527_s3 + $0x70] sm:$0xff]  ;;  %v121_v48 = vld [vmem:[%s527_s3 + $0x78] sm:$0xff]  ;;  %v18_v49 = vld [vmem:[%s528_s1] sm:$0xff]  ;;  %s378_s3 = smov 8  }
   0xc   :  { %330 = vmatpush3.bf16.msra.mxu0 %v329_v14  ;;  %v368_v50 = vpack.c.bf16 %v121_v48, %v120_v47  ;;  %v105_v51 = vmul.f32 %v18_v49, %v18_v49 }
   0xd   :  { %331 = vmatprep.subr.bf16.mxu0 %v375_v0 }
   0xe   :  { %354 = vmatpush3.bf16.msra.mxu1 %v353_v24 }
   0xf   :  { %355 = vmatprep.subr.bf16.mxu1 %v375_v0 }
  0x10   :  { %333 = vmatpush3.bf16.msra.mxu0 %v332_v21 }
  0x11   :  { %334 = vmatprep.subr.bf16.mxu0 %v375_v0 }
  0x12   :  { %357 = vmatpush3.bf16.msra.mxu1 %v356_v30 }
  0x13   :  { %358 = vmatprep.subr.bf16.mxu1 %v375_v0 }
  0x14   :  { %336 = vmatpush3.bf16.msra.mxu0 %v335_v27 }
  0x15   :  { %337 = vmatprep.subr.bf16.mxu0 %v375_v0 }
  0x16   :  { %360 = vmatpush3.bf16.msra.mxu1 %v359_v36 }
  0x17   :  { %361 = vmatprep.subr.bf16.mxu1 %v375_v0 }
  0x18   :  { %339 = vmatpush3.bf16.msra.mxu0 %v338_v33 }
  0x19   :  { %340 = vmatprep.subr.bf16.mxu0 %v375_v0 }
  0x1a   :  { %363 = vmatpush3.bf16.msra.mxu1 %v362_v42 }
  0x1b   :  { %364 = vmatprep.subr.bf16.mxu1 %v375_v0 }
  0x1c   :  { %342 = vmatpush3.bf16.msra.mxu0 %v341_v39 }
  0x1d   :  { %343 = vmatprep.subr.bf16.mxu0 %v375_v0 }
  0x1e   :  { %366 = vmatpush3.bf16.msra.mxu1 %v365_v46 }
  0x1f   :  { %367 = vmatprep.subr.bf16.mxu1 %v375_v0 }
  0x20   :  { %345 = vmatpush3.bf16.msra.mxu0 %v344_v45 }
  0x22   :  { %369 = vmatpush3.bf16.msra.mxu1 %v368_v50 }
  0x23   :  { %285 = vmatmul.mubr.f32.vlgmr.msra.gmra.mrb[0].mxu0 %v18_v49 }
  0x25   :  { %320 = vmatmul.mubr.f32.vlgmr.msra.gmra.mrb[0].mxu1 %v105_v51 }
  0xf6   :  { %v101_v52 = vpop.f32.mrb[0].mxu0 }
  0xf7   :  { %v286_v53 = vpop.f32.mrb[1].mxu0  ;;  %v192_v54 = vmul.f32 %v101_v52, %v101_v52  ;;  %v206_v63 = vadd.f32 %v205_v60, %v101_v52 }
  0xf8   :  { %v188_v56 = vpop.f32.mrb[0].mxu1 }
  0xf9   :  { %v194_v55 = vsel %vm193_vm1, %v192_v54, 0.0  ;;  %v321_v57 = vpop.f32.mrb[1].mxu1 }
  0xfa   :  { %195 = vadd.xlane.f32.xlu0 %v194_v55 }
 0x110   :  { %199 = vrot.lane.b32.xlu0 %v188_v56, %s378_s3 }
 0x187   :  { %v196_v58 = vpop.xlane.xlu0 %195 }
 0x188   :  { %v197_v59 = vsub.f32 %v196_v58, %v192_v54 }
 0x18b   :  { %v200_v61 = vpop.permute.xlu0 %199 }
 0x18c   :  { %v202_v62 = vsub.f32 %v197_v59, %v200_v61 }
 0x18e   :  { %v203_v0 = vmul.f32 0.5, %v202_v62 }
 0x190   :  { %v207_v1 = vadd.f32 %v206_v63, %v203_v0 }
 0x192   :  { %209 = vrot.lane.b32.xlu1 %v207_v1, %s379_s29 }
 0x204   :  { %v210_v2 = vpop.permute.xlu1 %209 }
 0x205   :  { %213 = vst.msk [vmem:[%s530_s4] sm:$0xff] %vm212_vm2, %v210_v2 }

</bundles_post_ra>
